<compile_context>
chip_gen: v5e
topology: v5e:2x2
jax: 0.10.0
libtpu: 0.0.40
codegen_flags: <defaults>
</compile_context>

<pallas_src>
import jax
import jax.numpy as jnp
from jax.experimental import pallas as pl
from jax.experimental.pallas import tpu as pltpu


def head_kernel(x_ref, w1_ref, b1_ref, w2_ref, b2_ref, o_ref):
    # Dropout is identity in eval mode (inference), so it is not materialized.
    # TODO(synk): training-mode dropout would need pltpu.prng_seed/prng_random_bits.
    x = x_ref[...]  # bf16 tile (rows, Hp)

    # dense: x @ W1 (bf16 MXU, f32 accumulate), +b1 and tanh in f32.
    h = jnp.dot(x, w1_ref[...], preferred_element_type=jnp.float32)
    h = jnp.tanh(h + b1_ref[...])

    # out_proj: h @ W2 (bf16 MXU, f32 accumulate), +b2 in f32.
    y = jnp.dot(h.astype(w2_ref.dtype), w2_ref[...],
                preferred_element_type=jnp.float32)
    y = y + b2_ref[...]
    o_ref[...] = y.astype(o_ref.dtype)


def _round_up(x, m):
    return ((x + m - 1) // m) * m


def model_head_forward(features, w1, b1, w2, b2, *,
                       block_rows=512, dot_dtype=jnp.bfloat16):
    """features: [..., H]; w1: [H, H] (already transposed, i.e. dense.weight.T);
    b1: [H]; w2: [H, L] (out_proj.weight.T); b2: [L].

    Any leading dims are flattened to a single row axis and tiled.
    Hidden (H) and labels (L) are zero-padded to multiples of 128 so the
    matmuls and output stores are lane-dense; padding is sliced off at the end.
    VMEM budget per grid step ~= 2*block_rows*Hp*2B (x, double-buffered)
    + Hp*Hp*2B + Hp*Lp*2B (weights, single-buffered) + 2*block_rows*Lp*out
    which fits easily under the v7x 64 MiB budget for block_rows<=1024, H<=4096.
    """
    orig_shape = features.shape
    H = orig_shape[-1]
    L = w2.shape[1]
    out_dtype = features.dtype

    x2d = features.reshape(-1, H)
    R = x2d.shape[0]

    # Lane-dense padding for hidden and label axes.
    Hp = _round_up(max(H, 1), 128)
    Lp = _round_up(max(L, 1), 128)

    # Row tiling: prefer a 128-aligned block; tiny inputs get one full block.
    Rp_min = _round_up(max(R, 1), 16)  # sublane alignment (bf16 packs 16 rows)
    if Rp_min <= block_rows:
        block_rows = Rp_min
        Rp = Rp_min
    else:
        block_rows = _round_up(block_rows, 128)
        Rp = _round_up(R, block_rows)

    # Zero-pad inputs / params. Padded hidden cols: x*0 + W1_pad(=0) + b1_pad(=0)
    # -> tanh(0)=0, and padded W2 rows are 0, so real logits are unaffected;
    # padded logit cols are exactly 0 and discarded below.
    x_p = jnp.zeros((Rp, Hp), dot_dtype).at[:R, :H].set(x2d.astype(dot_dtype))
    w1_p = jnp.zeros((Hp, Hp), dot_dtype).at[:H, :H].set(w1.astype(dot_dtype))
    b1_p = jnp.zeros((1, Hp), jnp.float32).at[0, :H].set(b1.astype(jnp.float32))
    w2_p = jnp.zeros((Hp, Lp), dot_dtype).at[:H, :L].set(w2.astype(dot_dtype))
    b2_p = jnp.zeros((1, Lp), jnp.float32).at[0, :L].set(b2.astype(jnp.float32))

    grid = (Rp // block_rows,)

    itemsize = jnp.dtype(dot_dtype).itemsize
    cost = pl.CostEstimate(
        flops=2 * Rp * Hp * Hp + 2 * Rp * Hp * Lp,
        transcendentals=Rp * Hp,  # tanh
        bytes_accessed=(Rp * Hp * itemsize            # x
                        + Hp * Hp * itemsize          # W1
                        + Hp * Lp * itemsize          # W2
                        + Rp * Lp * jnp.dtype(out_dtype).itemsize),  # out
    )

    resident = pl.Buffered(buffer_count=1)  # constant blocks: no double buffer

    out_p = pl.pallas_call(
        head_kernel,
        out_shape=jax.ShapeDtypeStruct((Rp, Lp), out_dtype),
        grid_spec=pl.GridSpec(
            grid=grid,
            in_specs=[
                pl.BlockSpec((block_rows, Hp), lambda i: (i, 0)),   # x tile
                pl.BlockSpec((Hp, Hp), lambda i: (0, 0),
                             pipeline_mode=resident),               # W1
                pl.BlockSpec((1, Hp), lambda i: (0, 0),
                             pipeline_mode=resident),               # b1
                pl.BlockSpec((Hp, Lp), lambda i: (0, 0),
                             pipeline_mode=resident),               # W2
                pl.BlockSpec((1, Lp), lambda i: (0, 0),
                             pipeline_mode=resident),               # b2
            ],
            out_specs=pl.BlockSpec((block_rows, Lp), lambda i: (i, 0)),
        ),
        compiler_params=pltpu.CompilerParams(
            dimension_semantics=("parallel",),
        ),
        cost_estimate=cost,
    )(x_p, w1_p, b1_p, w2_p, b2_p)

    # Strip padding, restore leading dims.
    return out_p[:R, :L].reshape(*orig_shape[:-1], L)


def reference_forward(features, w1, b1, w2, b2):
    x = features.astype(jnp.float32)
    h = jnp.tanh(x @ w1 + b1)
    return (h @ w2 + b2).astype(features.dtype)


if __name__ == "__main__":
    # Small, forward-consistent shapes: batch=8, hidden=32, num_labels=6.
    B, H, L = 8, 32, 6

    key = jax.random.PRNGKey(0)
    kx, kw1, kb1, kw2, kb2 = jax.random.split(key, 5)

    features = jax.random.normal(kx, (B, H), dtype=jnp.float32)

    # Deterministic synthetic parameters (PyTorch Linear shapes, pre-transposed
    # so the kernel computes x @ W + b directly).
    w1 = jax.random.normal(kw1, (H, H), dtype=jnp.float32) * 0.05   # dense.weight.T
    b1 = jax.random.normal(kb1, (H,), dtype=jnp.float32) * 0.01     # dense.bias
    w2 = jax.random.normal(kw2, (H, L), dtype=jnp.float32) * 0.05   # out_proj.weight.T
    b2 = jax.random.normal(kb2, (L,), dtype=jnp.float32) * 0.01     # out_proj.bias

    out = model_head_forward(features, w1, b1, w2, b2)
    out = jax.block_until_ready(out)

    ref = reference_forward(features, w1, b1, w2, b2)
    assert out.shape == (B, L), out.shape
    max_err = jnp.max(jnp.abs(out - ref))
    # bf16 matmul inputs with f32 accumulation -> ~1e-3 abs error at this scale.
    assert jnp.allclose(out, ref, atol=2e-2, rtol=2e-2), f"max abs err {max_err}"

    print("KERNEL_OK")
</pallas_src>

<mosaic_0001>
module attributes {stable_mosaic.version = 11 : i64} {
  func.func @head_kernel(%arg0: i32, %arg1: memref<16x128xbf16, #tpu.memory_space<vmem>>, %arg2: memref<128x128xbf16, #tpu.memory_space<vmem>>, %arg3: memref<1x128xf32, #tpu.memory_space<vmem>>, %arg4: memref<128x128xbf16, #tpu.memory_space<vmem>>, %arg5: memref<1x128xf32, #tpu.memory_space<vmem>>, %arg6: memref<16x128xf32, #tpu.memory_space<vmem>>) attributes {dimension_semantics = [#tpu.dimension_semantics<parallel>], iteration_bounds = array<i64: 1>, scalar_prefetch = 0 : i64, scratch_operands = 0 : i64, tpu.core_type = #tpu.core_type<tc>, window_params = [{transform_indices = @transform_0, window_bounds = array<i64: 16, 128>}, {pipeline_mode = #tpu.pipeline_mode<synchronous>, transform_indices = @transform_1, window_bounds = array<i64: 128, 128>}, {pipeline_mode = #tpu.pipeline_mode<synchronous>, transform_indices = @transform_2, window_bounds = array<i64: 1, 128>}, {pipeline_mode = #tpu.pipeline_mode<synchronous>, transform_indices = @transform_3, window_bounds = array<i64: 128, 128>}, {pipeline_mode = #tpu.pipeline_mode<synchronous>, transform_indices = @transform_4, window_bounds = array<i64: 1, 128>}, {transform_indices = @transform_5, window_bounds = array<i64: 16, 128>}]} {
    %c0 = arith.constant 0 : index
    %c0_0 = arith.constant 0 : index
    %0 = vector.load %arg1[%c0, %c0_0] : memref<16x128xbf16, #tpu.memory_space<vmem>>, vector<16x128xbf16>
    %c0_1 = arith.constant 0 : index
    %c0_2 = arith.constant 0 : index
    %1 = vector.load %arg2[%c0_1, %c0_2] : memref<128x128xbf16, #tpu.memory_space<vmem>>, vector<128x128xbf16>
    %cst = arith.constant dense<0.000000e+00> : vector<16x128xf32>
    %2 = tpu.matmul %0, %1, %cst {dimension_numbers = #tpu.dot_dimension_numbers<[1], [0], [0], [1], [0, 0, 1, 1], [], []>} : vector<16x128xbf16>, vector<128x128xbf16>, vector<16x128xf32> -> vector<16x128xf32>
    %c0_3 = arith.constant 0 : index
    %c0_4 = arith.constant 0 : index
    %3 = vector.load %arg3[%c0_3, %c0_4] : memref<1x128xf32, #tpu.memory_space<vmem>>, vector<1x128xf32>
    %4 = vector.broadcast %3 : vector<1x128xf32> to vector<16x128xf32>
    %5 = arith.addf %2, %4 : vector<16x128xf32>
    %6 = math.tanh %5 : vector<16x128xf32>
    %7 = arith.truncf %6 : vector<16x128xf32> to vector<16x128xbf16>
    %c0_5 = arith.constant 0 : index
    %c0_6 = arith.constant 0 : index
    %8 = vector.load %arg4[%c0_5, %c0_6] : memref<128x128xbf16, #tpu.memory_space<vmem>>, vector<128x128xbf16>
    %cst_7 = arith.constant dense<0.000000e+00> : vector<16x128xf32>
    %9 = tpu.matmul %7, %8, %cst_7 {dimension_numbers = #tpu.dot_dimension_numbers<[1], [0], [0], [1], [0, 0, 1, 1], [], []>} : vector<16x128xbf16>, vector<128x128xbf16>, vector<16x128xf32> -> vector<16x128xf32>
    %c0_8 = arith.constant 0 : index
    %c0_9 = arith.constant 0 : index
    %10 = vector.load %arg5[%c0_8, %c0_9] : memref<1x128xf32, #tpu.memory_space<vmem>>, vector<1x128xf32>
    %11 = vector.broadcast %10 : vector<1x128xf32> to vector<16x128xf32>
    %12 = arith.addf %9, %11 : vector<16x128xf32>
    %c0_10 = arith.constant 0 : index
    %c0_11 = arith.constant 0 : index
    %13 = vector.load %arg6[%c0_10, %c0_11] : memref<16x128xf32, #tpu.memory_space<vmem>>, vector<16x128xf32>
    tpu.vector_store %arg6[%c0_10, %c0_11], %12 {strides = array<i32>} : memref<16x128xf32, #tpu.memory_space<vmem>>, vector<16x128xf32>,
    return
  }
  func.func @transform_0(%arg0: i32) -> (i32, i32) {
    %c0_i32 = arith.constant 0 : i32
    %c0_i32_0 = arith.constant 0 : i32
    return %arg0, %c0_i32 : i32, i32
  }
  func.func @transform_1(%arg0: i32) -> (i32, i32) {
    %c0_i32 = arith.constant 0 : i32
    %c0_i32_0 = arith.constant 0 : i32
    %c0_i32_1 = arith.constant 0 : i32
    return %c0_i32, %c0_i32_0 : i32, i32
  }
  func.func @transform_2(%arg0: i32) -> (i32, i32) {
    %c0_i32 = arith.constant 0 : i32
    %c0_i32_0 = arith.constant 0 : i32
    %c0_i32_1 = arith.constant 0 : i32
    return %c0_i32, %c0_i32_0 : i32, i32
  }
  func.func @transform_3(%arg0: i32) -> (i32, i32) {
    %c0_i32 = arith.constant 0 : i32
    %c0_i32_0 = arith.constant 0 : i32
    %c0_i32_1 = arith.constant 0 : i32
    return %c0_i32, %c0_i32_0 : i32, i32
  }
  func.func @transform_4(%arg0: i32) -> (i32, i32) {
    %c0_i32 = arith.constant 0 : i32
    %c0_i32_0 = arith.constant 0 : i32
    %c0_i32_1 = arith.constant 0 : i32
    return %c0_i32, %c0_i32_0 : i32, i32
  }
  func.func @transform_5(%arg0: i32) -> (i32, i32) {
    %c0_i32 = arith.constant 0 : i32
    %c0_i32_0 = arith.constant 0 : i32
    return %arg0, %c0_i32 : i32, i32
  }
}

</mosaic_0001>

<bundles_post_ra>
// kernel: tpu_custom_call.1
= control target key start
LH: loop header
LB: loop body
LE: loop exit
PB: predicated region body
PF: predicated region fallthrough
CT: control target
= control target key end

     0   :  { %10 = vsyncpa [#allocation3], 0  ;;  %s522_s0 = inlined_call_operand.hbm [shape: bf16[16,128], index: 0, kind: input, shape index: {}]   ;;  %s523_s1 = inlined_call_operand.hbm [shape: bf16[128,128], index: 1, kind: input, shape index: {}]   ;;  %s524_s2 = inlined_call_operand.vmem [shape: f32[1,128], index: 2, kind: input, shape index: {}]   ;;  %s525_s3 = inlined_call_operand.hbm [shape: bf16[128,128], index: 3, kind: input, shape index: {}]   ;;  %s526_s4 = inlined_call_operand.vmem [shape: f32[1,128], index: 4, kind: input, shape index: {}]   ;;  %s527_s5 = inlined_call_operand.hbm [shape: f32[16,128], index: 5, kind: output, shape index: {}]  }
   0x1   :  { %11 = vsyncpa [#allocation6], 0 }
   0x2   :  { %12 = vsyncpa [#allocation4], 0  ;;  %s30_s20 = sshll.u32 %s523_s1, 4  ;;  %s466_s21 = smov [#allocation5]   ;;  %s31_s20 = int_to_ptr.hbm [resolvable:$true] %s30_s20 }
   0x3   :  { %s32_s22 = sshll.u32 %s466_s21, 4  ;;  %s17_s25 = sshll.u32 %s522_s0, 4  ;;  %s33_s22 = int_to_ptr.vmem [resolvable:$true] %s32_s22  ;;  %s18_s25 = int_to_ptr.hbm [resolvable:$true] %s17_s25 }
   0x4   :  { %s467_s26 = smov 64   ;;  %s468_s27 = smov 4  }
   0x5   :  { %38 = dma.hbm_to_vmem [thread:$0]  %s31_s20, 1024, %s33_s22, [#allocation6], %s467_s26, %s467_s26, %s468_s27  }
   0x6   :  { %s469_s28 = smov [#allocation2]   ;;  %s45_s7 = sshll.u32 %s525_s3, 4  ;;  %s46_s7 = int_to_ptr.hbm [resolvable:$true] %s45_s7 }
   0x7   :  { %s19_s29 = sshll.u32 %s469_s28, 4  ;;  %s470_s1 = smov [#allocation7]   ;;  %s20_s29 = int_to_ptr.vmem [resolvable:$true] %s19_s29 }
   0x8   :  { %25 = dma.hbm_to_vmem [thread:$0]  %s18_s25, 128, %s20_s29, [#allocation3], %s467_s26, %s467_s26, %s468_s27  }
   0x9   :  { %s47_s8 = sshll.u32 %s470_s1, 4  ;;  %s48_s8 = int_to_ptr.vmem [resolvable:$true] %s47_s8 }
   0xa   :  { %53 = dma.hbm_to_vmem [thread:$0]  %s46_s7, 1024, %s48_s8, [#allocation6], %s467_s26, %s467_s26, %s468_s27  }
   0xb   :  { %460 = dma.done.wait [#allocation3], 128  }
   0xc   :  { %461 = vsyncadd [#allocation3], 4294967168 }
   0xd   :  { %462 = dma.done.wait [#allocation6], 2048  }
   0xe   :  { %463 = vsyncadd [#allocation6], 4294965248  ;;  %v341_v0 = vld [vmem:[#allocation5 + $0x38] sm:$0xff]  ;;  %v340_v1 = vld [vmem:[#allocation5 + $0x30] sm:$0xff]  ;;  %s471_s11 = smov [#allocation8]   ;;  %s251_s14 = sshll.u32 %s527_s5, 4  ;;  %s252_s14 = int_to_ptr.hbm [resolvable:$true] %s251_s14 }
   0xf   :  { %144 = vmatpush.bf16.msra.mxu0 %v341_v0  ;;  %v349_v2 = vld [vmem:[#allocation7 + $0x38] sm:$0xff]  ;;  %v348_v3 = vld [vmem:[#allocation7 + $0x30] sm:$0xff]  ;;  %v339_v4 = vld [vmem:[#allocation5 + $0x28] sm:$0xff]  ;;  %s249_s12 = sshll.u32 %s471_s11, 4  ;;  %s472_s15 = smov 128   ;;  %s250_s12 = int_to_ptr.vmem [resolvable:$true] %s249_s12 }
  0x10   :  { %229 = vmatpush.bf16.msra.mxu1 %v349_v2  ;;  %v347_v5 = vld [vmem:[#allocation7 + $0x28] sm:$0xff]  ;;  %v338_v6 = vld [vmem:[#allocation5 + $0x20] sm:$0xff]  ;;  %v337_v7 = vld [vmem:[#allocation5 + $0x18] sm:$0xff]  ;;  %s473_s16 = smov 8  }
  0x11   :  { %v336_v8 = vld [vmem:[#allocation5 + $0x10] sm:$0xff]  ;;  %v335_v9 = vld [vmem:[#allocation5 + $0x8] sm:$0xff]  ;;  %v334_v10 = vld [vmem:[#allocation5] sm:$0xff] }
  0x12   :  { %v333_v11 = vld [vmem:[#allocation2] sm:$0xff]  ;;  %v346_v12 = vld [vmem:[#allocation7 + $0x20] sm:$0xff]  ;;  %v344_v14 = vld [vmem:[#allocation7 + $0x10] sm:$0xff] }
  0x13   :  { %145 = vmatpush.bf16.msra.mxu0 %v340_v1  ;;  %v345_v13 = vld [vmem:[#allocation7 + $0x18] sm:$0xff]  ;;  %v343_v15 = vld [vmem:[#allocation7 + $0x8] sm:$0xff]  ;;  %v342_v16 = vld [vmem:[#allocation7] sm:$0xff] }
  0x14   :  { %230 = vmatpush.bf16.msra.mxu1 %v348_v3  ;;  %v358_v18 = vld [vmem:[%s524_s2] ss:$0 sm:$0xff] }
  0x15   :  { %v359_v25 = vld [vmem:[%s526_s4] ss:$0 sm:$0xff] }
  0x17   :  { %146 = vmatpush.bf16.msra.mxu0 %v339_v4 }
  0x18   :  { %231 = vmatpush.bf16.msra.mxu1 %v347_v5 }
  0x1b   :  { %147 = vmatpush.bf16.msra.mxu0 %v338_v6 }
  0x1c   :  { %232 = vmatpush.bf16.msra.mxu1 %v346_v12 }
  0x1f   :  { %148 = vmatpush.bf16.msra.mxu0 %v337_v7 }
  0x20   :  { %233 = vmatpush.bf16.msra.mxu1 %v345_v13 }
  0x23   :  { %149 = vmatpush.bf16.msra.mxu0 %v336_v8 }
  0x24   :  { %234 = vmatpush.bf16.msra.mxu1 %v344_v14 }
  0x27   :  { %150 = vmatpush.bf16.msra.mxu0 %v335_v9 }
  0x28   :  { %235 = vmatpush.bf16.msra.mxu1 %v343_v15 }
  0x2b   :  { %151 = vmatpush.bf16.msra.mxu0 %v334_v10 }
  0x2c   :  { %236 = vmatpush.bf16.msra.mxu1 %v342_v16 }
  0x2e   :  { %152 = vmatmul.bf16.vlgmr.msra.gmra.mxu0 %v333_v11 }
  0xab   :  { %v153_v17 = vpop.f32.mrf.mxu0 }
  0xac   :  { %v154_v19 = vadd.f32 %v358_v18, %v153_v17 }
  0xae   :  { %360 = vtanh.f32 %v154_v19 }
  0xb3   :  { %v155_v20 = vpop.f32.mrf.mxu0 }
  0xb4   :  { %v156_v21 = vadd.f32 %v358_v18, %v155_v20  ;;  %v361_v22 = vpop.eup %360 }
  0xb6   :  { %362 = vtanh.f32 %v156_v21 }
  0xbc   :  { %v363_v23 = vpop.eup %362 }
  0xbd   :  { %v160_v24 = vpack.c.bf16 %v363_v23, %v361_v22 }
  0xbf   :  { %237 = vmatmul.bf16.vlgmr.msra.gmra.mxu1 %v160_v24 }
 0x13c   :  { %v238_v26 = vpop.f32.mrf.mxu1 }
 0x13d   :  { %v239_v27 = vadd.f32 %v359_v25, %v238_v26 }
 0x13f   :  { %243 = vst [vmem:[#allocation8] sm:$0xff] %v239_v27 }
 0x144   :  { %v240_v28 = vpop.f32.mrf.mxu1 }
 0x145   :  { %v241_v29 = vadd.f32 %v359_v25, %v240_v28 }
 0x147   :  { %244 = vst [vmem:[#allocation8 + $0x8] sm:$0xff] %v241_v29 }
 0x148   :  { %257 = dma.vmem_to_hbm [thread:$0]  %s250_s12, 256, %s252_s14, [#allocation4], %s472_s15, %s472_s15, %s473_s16  }
 0x149   :  { %464 = dma.done.wait [#allocation4], 256  }
 0x14a   :  { %465 = vsyncadd [#allocation4], 4294967040 }
 0x14b   :  { %262 = vsyncpa [#allocation3], 1 }
 0x14c   :  { %263 = vsyncpa [#allocation6], 1 }
 0x14d   :  { %264 = vsyncpa [#allocation4], 1 }

</bundles_post_ra>
